<compile_context>
chip_gen: v6e
topology: v6e:2x2x1
jax: 0.10.0
libtpu: 0.0.40
codegen_flags: <defaults>
</compile_context>

<pallas_src>
import functools

import numpy as np
import jax
import jax.numpy as jnp
from jax.experimental import pallas as pl
from jax.experimental.pallas import tpu as pltpu

LANE = 128  # lane width; also the padded logits width


# ------------------------------ fused kernel -------------------------------- #

def _fused_forward_kernel(
        xin_ref, clsme_ref, oh_ref, pbias_ref,       # per-proposal (blocked over grid)
        w_wide_ref, w_narrow_ref, bias_ref,          # resident parameter slabs
        out_ref,
        *, n_trajs, l_out, dim_enti, dim_clsme, dim_ffn, d_in2):
    """One proposal of Base_C.forward_propagation per grid step, all in vregs."""
    E, C, F = dim_enti, dim_clsme, dim_ffn
    pool = l_out // 2
    n_rows = n_trajs * l_out          # rows of the paired-timestep activation

    def mm(a, b):
        return jnp.dot(a, b, preferred_element_type=jnp.float32)

    # static row offsets into the packed weight slabs (must match pack_params)
    o_w1 = 0
    o_w2 = o_w1 + d_in2
    o_wg = o_w2 + 4 * E
    o_wh2 = o_wg + (C + E)
    o_wc = 0
    o_we1 = 8 * E
    o_we2 = o_we1 + pool * E

    # ---- fc_bbox2enti & fc_feat2enti (two timesteps per row, block-diag) ------
    xin = xin_ref[0]                                               # (n*l_out, 2*(8+df))
    h1 = jnp.maximum(mm(xin, w_wide_ref[o_w1:o_w1 + d_in2, 0:4 * E])
                     + bias_ref[0:1, 0:4 * E], 0.0)
    act = jnp.maximum(mm(h1, w_wide_ref[o_w2:o_w2 + 4 * E, 0:4 * E])
                      + bias_ref[1:2, 0:4 * E], 0.0)               # rows j-major: [x(2j) | x(2j+1)]

    # ---- Conv1d(2E -> E, k=3, s=2, p=1) as ONE matmul -------------------------
    # tap_prev[r] = act[r - n_trajs] (previous output position of same traj),
    # zeros for j == 0 (the left pad).  a2 lanes = [x(2j) | x(2j+1) | x(2j-2) | x(2j-1)].
    tap_prev = jnp.concatenate(
        [jnp.zeros((n_trajs, 4 * E), jnp.float32), act[:n_rows - n_trajs, :]], axis=0)
    a2 = jnp.concatenate([act, tap_prev], axis=1)                  # (n*l_out, 8E)
    conv = mm(a2, w_narrow_ref[o_wc:o_wc + 8 * E, :]) + bias_ref[2:3, 0:E]   # (n*l_out, E)

    # ---- adaptive_max_pool1d (l_out -> pool): bin m = max over rows j=2m,2m+1 --
    pooled = jnp.concatenate(
        [jnp.maximum(conv[(2 * m) * n_trajs:(2 * m + 1) * n_trajs, :],
                     conv[(2 * m + 1) * n_trajs:(2 * m + 2) * n_trajs, :])
         for m in range(pool)], axis=1)                            # (n, pool*E), bin-major lanes

    # ---- fc_enti2enco (channel-major flatten folded into bin-major we1 rows) --
    hid = jnp.maximum(mm(pooled, w_narrow_ref[o_we1:o_we1 + pool * E, :])
                      + bias_ref[3:4, 0:E], 0.0)                   # (n, E)
    enco = jnp.maximum(mm(hid, w_narrow_ref[o_we2:o_we2 + E, :])
                       + bias_ref[4:5, 0:E], 0.0)                  # (n, E)

    # ---- prediction head -------------------------------------------------------
    ce = jnp.concatenate([clsme_ref[0], enco], axis=1)             # (n, C+E)
    g = mm(ce, w_wide_ref[o_wg:o_wg + C + E, 0:2 * F])             # (n, 2F) = [sub-role | obj-role]
    g_stack = jnp.concatenate([g[:, 0:F], g[:, F:2 * F]], axis=0)  # (2n, F)
    hh = jnp.maximum(mm(oh_ref[0], g_stack) + bias_ref[5:6, 0:F], 0.0)   # (P_pad, F)
    out_ref[0] = (mm(hh, w_wide_ref[o_wh2:o_wh2 + F, :])
                  + bias_ref[6:7, :] + pbias_ref[0])               # (P_pad, LANE), lane-dense


def pallas_fused_forward(xin, clsme, oh, pbias, w_wide, w_narrow, bias_slab, *,
                         n_trajs, l_out, dim_enti, dim_clsme, dim_ffn, d_in2, p_pad):
    B = xin.shape[0]
    kernel = functools.partial(
        _fused_forward_kernel, n_trajs=n_trajs, l_out=l_out, dim_enti=dim_enti,
        dim_clsme=dim_clsme, dim_ffn=dim_ffn, d_in2=d_in2)
    return pl.pallas_call(
        kernel,
        out_shape=jax.ShapeDtypeStruct((B, p_pad, LANE), jnp.float32),
        grid=(B,),
        in_specs=[
            pl.BlockSpec((1, n_trajs * l_out, d_in2), lambda b: (b, 0, 0)),
            pl.BlockSpec((1, n_trajs, dim_clsme), lambda b: (b, 0, 0)),
            pl.BlockSpec((1, p_pad, 2 * n_trajs), lambda b: (b, 0, 0)),
            pl.BlockSpec((1, p_pad, LANE), lambda b: (b, 0, 0)),
            pl.BlockSpec(w_wide.shape, lambda b: (0, 0)),     # VMEM-resident
            pl.BlockSpec(w_narrow.shape, lambda b: (0, 0)),   # VMEM-resident
            pl.BlockSpec(bias_slab.shape, lambda b: (0, 0)),  # VMEM-resident
        ],
        out_specs=pl.BlockSpec((1, p_pad, LANE), lambda b: (b, 0, 0)),
        compiler_params=pltpu.CompilerParams(dimension_semantics=("parallel",)),
    )(xin, clsme, oh, pbias, w_wide, w_narrow, bias_slab)


# ------------------------------- JAX glue ------------------------------------ #

def preprocess_bboxes(bboxes, video_wh):
    """Mirrors Base_C._preprocess_proposal bbox features: (n, L, 4) -> (n, L, 8)."""
    w, h = video_wh
    scale = jnp.array([1.0 / w, 1.0 / h, 1.0 / w, 1.0 / h], dtype=jnp.float32)
    b = bboxes.astype(jnp.float32) * scale
    ctx = (b[..., 2] + b[..., 0]) / 2.0
    cty = (b[..., 3] + b[..., 1]) / 2.0
    bw = b[..., 2] - b[..., 0]
    bh = b[..., 3] - b[..., 1]

    def diff_pad(v):
        d = v[:, 1:] - v[:, :-1]
        return jnp.pad(d, ((0, 0), (0, 1)))      # stack_with_padding: zero-pad at end

    feats = [ctx, diff_pad(ctx), cty, diff_pad(cty), bw, diff_pad(bw), bh, diff_pad(bh)]
    return jnp.stack(feats, axis=-1)


def adaptive_max_pool1d(x, out_len):
    """Exact PyTorch adaptive_max_pool1d over the last axis (reference only)."""
    L = x.shape[-1]
    outs = []
    for i in range(out_len):
        s = (i * L) // out_len
        e = -(-((i + 1) * L) // out_len)
        outs.append(jnp.max(x[..., s:e], axis=-1))
    return jnp.stack(outs, axis=-1)


def bce_with_logits_mean(logits, labels):
    return jnp.mean(jnp.maximum(logits, 0.0) - logits * labels
                    + jnp.log1p(jnp.exp(-jnp.abs(logits))))


def init_params(key, cfg):
    dim_feat, dim_clsme = cfg['dim_feat'], cfg['dim_clsme']
    E, F = cfg['dim_enti'], cfg['dim_ffn']
    num_pred, num_enti, pool = cfg['num_pred_cats'], cfg['num_enti_cats'], cfg['enco_pool_len']
    ks = iter(jax.random.split(key, 16))

    def lin(k, fi, fo):  # xavier-normal, stored as (in, out) right-multiply matrix
        std = (2.0 / (fi + fo)) ** 0.5
        return std * jax.random.normal(k, (fi, fo), dtype=jnp.float32)

    p = {}
    p['bbox2enti_w1'] = lin(next(ks), 8, E);        p['bbox2enti_b1'] = jnp.zeros((E,), jnp.float32)
    p['bbox2enti_w2'] = lin(next(ks), E, E);        p['bbox2enti_b2'] = jnp.zeros((E,), jnp.float32)
    p['feat2enti_w1'] = lin(next(ks), dim_feat, E); p['feat2enti_b1'] = jnp.zeros((E,), jnp.float32)
    p['feat2enti_w2'] = lin(next(ks), E, E);        p['feat2enti_b2'] = jnp.zeros((E,), jnp.float32)
    cin, cout, kk = 2 * E, E, 3
    std = (2.0 / (cin * kk + cout * kk)) ** 0.5
    p['conv_w'] = std * jax.random.normal(next(ks), (kk, cin, cout), dtype=jnp.float32)
    p['conv_b'] = jnp.zeros((cout,), jnp.float32)
    p['enti2enco_w1'] = lin(next(ks), E * pool, E); p['enti2enco_b1'] = jnp.zeros((E,), jnp.float32)
    p['enti2enco_w2'] = lin(next(ks), E, E);        p['enti2enco_b2'] = jnp.zeros((E,), jnp.float32)
    p['head_w1'] = lin(next(ks), 2 * dim_clsme + 2 * E, F); p['head_b1'] = jnp.zeros((F,), jnp.float32)
    p['head_w2'] = lin(next(ks), F, num_pred);              p['head_b2'] = jnp.zeros((num_pred,), jnp.float32)
    # bias_matrix (torch loads from .npy; deterministic synthetic here)
    p['bias_matrix'] = 0.1 * jax.random.normal(next(ks), (num_enti, num_enti, num_pred),
                                               dtype=jnp.float32)
    return p


def pack_params(p, cfg):
    """One-time repack of the torch-layout params into fused-kernel operand slabs."""
    E, C, F = cfg['dim_enti'], cfg['dim_clsme'], cfg['dim_ffn']
    pool, dim_feat = cfg['enco_pool_len'], cfg['dim_feat']
    num_pred, num_enti = cfg['num_pred_cats'], cfg['num_enti_cats']
    d_in = 8 + dim_feat
    d_in2 = 2 * d_in
    assert 4 * E <= LANE and 2 * F <= LANE and num_pred <= LANE

    def pad_cols(w):
        return jnp.zeros((w.shape[0], LANE), jnp.float32).at[:, :w.shape[1]].set(w)

    # bbox/feat MLPs as block-diagonal matrices, duplicated for the paired-timestep layout
    w1 = jnp.zeros((d_in2, 4 * E), jnp.float32)
    b1 = jnp.zeros((4 * E,), jnp.float32)
    w2 = jnp.zeros((4 * E, 4 * E), jnp.float32)
    b2 = jnp.zeros((4 * E,), jnp.float32)
    for h in range(2):
        r0, c0 = h * d_in, h * 2 * E
        w1 = w1.at[r0:r0 + 8, c0:c0 + E].set(p['bbox2enti_w1'])
        w1 = w1.at[r0 + 8:r0 + d_in, c0 + E:c0 + 2 * E].set(p['feat2enti_w1'])
        b1 = b1.at[c0:c0 + E].set(p['bbox2enti_b1'])
        b1 = b1.at[c0 + E:c0 + 2 * E].set(p['feat2enti_b1'])
        w2 = w2.at[c0:c0 + E, c0:c0 + E].set(p['bbox2enti_w2'])
        w2 = w2.at[c0 + E:c0 + 2 * E, c0 + E:c0 + 2 * E].set(p['feat2enti_w2'])
        b2 = b2.at[c0:c0 + E].set(p['bbox2enti_b2'])
        b2 = b2.at[c0 + E:c0 + 2 * E].set(p['feat2enti_b2'])

    # conv taps packed against a2 lanes = [x(2j) | x(2j+1) | x(2j-2) | x(2j-1)]
    wconv = jnp.concatenate([p['conv_w'][1], p['conv_w'][2],
                             jnp.zeros_like(p['conv_w'][0]), p['conv_w'][0]], axis=0)

    # fc_enti2enco layer 1: torch flattens (n, E, pool) channel-major -> regroup bin-major
    we1_perm = p['enti2enco_w1'].reshape(E, pool, E).transpose(1, 0, 2).reshape(pool * E, E)

    # head W1 regrouped to act on [clsme | enco] per traj, subject/object roles side by side
    wh1 = p['head_w1']
    wg = jnp.concatenate([
        jnp.concatenate([wh1[:C], wh1[C:2 * C]], axis=1),
        jnp.concatenate([wh1[2 * C:2 * C + E], wh1[2 * C + E:]], axis=1)], axis=0)

    wh2_pad = pad_cols(p['head_w2'])
    bh2_pad = jnp.zeros((LANE,), jnp.float32).at[:num_pred].set(p['head_b2'])

    # slabs (row offsets must match the kernel): wide = [w1 | w2 | wg | wh2], narrow = [wconv | we1 | we2]
    w_wide = jnp.concatenate([pad_cols(w1), pad_cols(w2), pad_cols(wg), wh2_pad], axis=0)
    w_narrow = jnp.concatenate([wconv, we1_perm, p['enti2enco_w2']], axis=0)

    bias_slab = jnp.zeros((8, LANE), jnp.float32)
    bias_slab = bias_slab.at[0, :4 * E].set(b1)
    bias_slab = bias_slab.at[1, :4 * E].set(b2)
    bias_slab = bias_slab.at[2, :E].set(p['conv_b'])
    bias_slab = bias_slab.at[3, :E].set(p['enti2enco_b1'])
    bias_slab = bias_slab.at[4, :E].set(p['enti2enco_b2'])
    bias_slab = bias_slab.at[5, :F].set(p['head_b1'])
    bias_slab = bias_slab.at[6, :].set(bh2_pad)

    bias_matrix_pad = jnp.zeros((num_enti, num_enti, LANE), jnp.float32
                                ).at[:, :, :num_pred].set(p['bias_matrix'])
    return dict(w_wide=w_wide, w_narrow=w_narrow, bias_slab=bias_slab,
                bias_matrix_pad=bias_matrix_pad)


def forward_propagation_batch(packed, bboxes, features, cat_ids, pair_ids, cfg, video_wh):
    """Batched Base_C.forward_propagation: one pallas_call with grid=(batch,)."""
    B, n_trajs, video_len, _ = bboxes.shape
    dim_feat, C = cfg['dim_feat'], cfg['dim_clsme']
    E, F, pool = cfg['dim_enti'], cfg['dim_ffn'], cfg['enco_pool_len']
    num_pred = cfg['num_pred_cats']
    l_out = video_len // 2
    # TODO(synk): fused pooling assumes l_out == 2 * enco_pool_len (exact pair bins).
    assert video_len % 2 == 0 and l_out == 2 * pool
    d_in = 8 + dim_feat
    d_in2 = 2 * d_in

    tb = preprocess_bboxes(bboxes.reshape(B * n_trajs, video_len, 4), video_wh)
    tb = tb.reshape(B, n_trajs, video_len, 8)
    per_t = jnp.concatenate([tb, features[..., :dim_feat]], axis=-1)        # (B, n, L, 8+df)
    # pair consecutive timesteps, order rows j-major (row = j*n + i)
    xin = per_t.reshape(B, n_trajs, l_out, d_in2).transpose(0, 2, 1, 3)
    xin = xin.reshape(B, l_out * n_trajs, d_in2)
    clsme = features[..., dim_feat:].mean(axis=2)                           # (B, n, C)

    P = pair_ids.shape[0]
    p_pad = max(8, -(-P // 8) * 8)                                          # sublane-align pairs
    oh = jnp.concatenate(
        [(pair_ids[:, 0:1] == jnp.arange(n_trajs)[None, :]).astype(jnp.float32),
         (pair_ids[:, 1:2] == jnp.arange(n_trajs)[None, :]).astype(jnp.float32)], axis=1)
    oh = jnp.zeros((p_pad, 2 * n_trajs), jnp.float32).at[:P].set(oh)
    oh = jnp.broadcast_to(oh[None], (B, p_pad, 2 * n_trajs))

    socat = cat_ids[:, pair_ids]                                            # (B, P, 2)
    pbias = packed['bias_matrix_pad'][socat[..., 0], socat[..., 1], :]      # (B, P, LANE)
    pbias = jnp.zeros((B, p_pad, LANE), jnp.float32).at[:, :P].set(pbias)

    logits_pad = pallas_fused_forward(
        xin, clsme, oh, pbias,
        packed['w_wide'], packed['w_narrow'], packed['bias_slab'],
        n_trajs=n_trajs, l_out=l_out, dim_enti=E, dim_clsme=C, dim_ffn=F,
        d_in2=d_in2, p_pad=p_pad)
    return logits_pad[:, :P, :num_pred]


def forward_train(packed, bboxes, features, cat_ids, pair_ids, labels, cfg, video_wh):
    logits = forward_propagation_batch(packed, bboxes, features, cat_ids, pair_ids,
                                       cfg, video_wh)
    cls_loss = bce_with_logits_mean(logits, labels)   # == cat over proposals then mean
    return cls_loss, {'cls': cls_loss}, logits

# TODO(synk): _forward_test / construct_triplet (topk, unique_with_idx_nd, data-dependent
# masking) have no clean static-shape Pallas equivalent and are not implemented.


# --------------------------- pure-JAX reference ------------------------------ #

def reference_forward(p, bboxes, features, cat_ids, pair_ids, cfg, video_wh):
    PREC = jax.lax.Precision.HIGHEST
    n_trajs, video_len, _ = bboxes.shape
    dim_feat, E, pool = cfg['dim_feat'], cfg['dim_enti'], cfg['enco_pool_len']

    def mlp2(x, w1, b1, w2, b2):
        h = jnp.maximum(jnp.matmul(x, w1, precision=PREC) + b1, 0.0)
        return jnp.maximum(jnp.matmul(h, w2, precision=PREC) + b2, 0.0)

    tb = mlp2(preprocess_bboxes(bboxes, video_wh),
              p['bbox2enti_w1'], p['bbox2enti_b1'], p['bbox2enti_w2'], p['bbox2enti_b2'])
    tv = mlp2(features[:, :, :dim_feat],
              p['feat2enti_w1'], p['feat2enti_b1'], p['feat2enti_w2'], p['feat2enti_b2'])
    enti = jnp.concatenate([tb, tv], axis=-1)                    # (n, L, 2E)
    x_pad = jnp.pad(enti, ((0, 0), (1, 1), (0, 0)))
    l_out = (video_len + 2 - 3) // 2 + 1
    conv = p['conv_b'][None, None, :]
    for k in range(3):
        tap = x_pad[:, k:k + 2 * l_out:2, :]
        conv = conv + jnp.einsum('nlc,co->nlo', tap, p['conv_w'][k], precision=PREC)
    pooled = adaptive_max_pool1d(conv.transpose(0, 2, 1), pool)  # (n, E, pool)
    enco = mlp2(pooled.reshape(n_trajs, -1),
                p['enti2enco_w1'], p['enti2enco_b1'], p['enti2enco_w2'], p['enti2enco_b2'])
    clsme_avg = features[:, :, dim_feat:].mean(axis=1)
    socat = cat_ids[pair_ids]
    pred_bias = p['bias_matrix'][socat[:, 0], socat[:, 1], :]
    combined = jnp.concatenate([clsme_avg[pair_ids[:, 0]], clsme_avg[pair_ids[:, 1]],
                                enco[pair_ids[:, 0]], enco[pair_ids[:, 1]]], axis=-1)
    h = jnp.maximum(jnp.matmul(combined, p['head_w1'], precision=PREC) + p['head_b1'], 0.0)
    return jnp.matmul(h, p['head_w2'], precision=PREC) + p['head_b2'] + pred_bias


# ----------------------------------- main ------------------------------------ #

if __name__ == "__main__":
    cfg = dict(num_pred_cats=16, num_enti_cats=8, dim_feat=32, dim_clsme=16,
               dim_enti=32, dim_ffn=64, enco_pool_len=4)
    batch, n_trajs, video_len = 8, 4, 16
    video_wh = (640.0, 480.0)

    key = jax.random.PRNGKey(0)
    k_param, k_box, k_wh, k_feat, k_cat, k_lab = jax.random.split(key, 6)

    params = init_params(k_param, cfg)
    packed = pack_params(params, cfg)

    xy = jax.random.uniform(k_box, (batch, n_trajs, video_len, 2), minval=0.0, maxval=400.0)
    wh = jax.random.uniform(k_wh, (batch, n_trajs, video_len, 2), minval=20.0, maxval=200.0)
    bboxes = jnp.concatenate([xy, xy + wh], axis=-1)                       # (8, 4, 16, 4)
    features = jax.random.normal(
        k_feat, (batch, n_trajs, video_len, cfg['dim_feat'] + cfg['dim_clsme']),
        dtype=jnp.float32)                                                  # (8, 4, 16, 48)
    cat_ids = jax.random.randint(k_cat, (batch, n_trajs), 0, cfg['num_enti_cats'])
    pair_ids = jnp.asarray(
        np.array([(i, j) for i in range(n_trajs) for j in range(n_trajs) if i != j],
                 dtype=np.int32))                                           # (12, 2)
    labels = jax.random.bernoulli(
        k_lab, 0.1, (batch, pair_ids.shape[0], cfg['num_pred_cats'])).astype(jnp.float32)

    fwd = jax.jit(functools.partial(forward_train, cfg=cfg, video_wh=video_wh))
    total_loss, loss_dict, pred_logits = fwd(packed, bboxes, features, cat_ids,
                                             pair_ids, labels)
    jax.block_until_ready((total_loss, pred_logits))

    ref_logits = jnp.stack([
        reference_forward(params, bboxes[b], features[b], cat_ids[b], pair_ids,
                          cfg, video_wh) for b in range(batch)])
    ref_logits = jax.block_until_ready(ref_logits)

    np.testing.assert_allclose(np.asarray(pred_logits), np.asarray(ref_logits),
                               rtol=1e-2, atol=1e-2)
    assert pred_logits.shape == (batch, pair_ids.shape[0], cfg['num_pred_cats'])
    assert bool(jnp.isfinite(total_loss))
    print("KERNEL_OK")
</pallas_src>

<mosaic_0001>
module attributes {stable_mosaic.version = 11 : i64} {
  func.func @_fused_forward_kernel(%arg0: i32, %arg1: memref<1x32x80xf32, #tpu.memory_space<vmem>>, %arg2: memref<1x4x16xf32, #tpu.memory_space<vmem>>, %arg3: memref<1x16x8xf32, #tpu.memory_space<vmem>>, %arg4: memref<1x16x128xf32, #tpu.memory_space<vmem>>, %arg5: memref<320x128xf32, #tpu.memory_space<vmem>>, %arg6: memref<416x32xf32, #tpu.memory_space<vmem>>, %arg7: memref<8x128xf32, #tpu.memory_space<vmem>>, %arg8: memref<1x16x128xf32, #tpu.memory_space<vmem>>) attributes {dimension_semantics = [#tpu.dimension_semantics<parallel>], iteration_bounds = array<i64: 8>, scalar_prefetch = 0 : i64, scratch_operands = 0 : i64, tpu.core_type = #tpu.core_type<tc>, window_params = [{transform_indices = @transform_0, window_bounds = array<i64: 1, 32, 80>}, {transform_indices = @transform_1, window_bounds = array<i64: 1, 4, 16>}, {transform_indices = @transform_2, window_bounds = array<i64: 1, 16, 8>}, {transform_indices = @transform_3, window_bounds = array<i64: 1, 16, 128>}, {pipeline_mode = #tpu.pipeline_mode<synchronous>, transform_indices = @transform_4, window_bounds = array<i64: 320, 128>}, {pipeline_mode = #tpu.pipeline_mode<synchronous>, transform_indices = @transform_5, window_bounds = array<i64: 416, 32>}, {pipeline_mode = #tpu.pipeline_mode<synchronous>, transform_indices = @transform_6, window_bounds = array<i64: 8, 128>}, {transform_indices = @transform_7, window_bounds = array<i64: 1, 16, 128>}]} {
    %c0 = arith.constant 0 : index
    %c0_0 = arith.constant 0 : index
    %c0_1 = arith.constant 0 : index
    %0 = vector.load %arg1[%c0, %c0_0, %c0_1] : memref<1x32x80xf32, #tpu.memory_space<vmem>>, vector<1x32x80xf32>
    %1 = vector.shape_cast %0 : vector<1x32x80xf32> to vector<32x80xf32>
    %c0_2 = arith.constant 0 : index
    %c0_3 = arith.constant 0 : index
    %2 = vector.load %arg5[%c0_2, %c0_3] : memref<320x128xf32, #tpu.memory_space<vmem>>, vector<80x128xf32>
    %cst = arith.constant dense<0.000000e+00> : vector<32x128xf32>
    %3 = tpu.matmul %1, %2, %cst {dimension_numbers = #tpu.dot_dimension_numbers<[1], [0], [0], [1], [0, 0, 1, 1], [], []>} : vector<32x80xf32>, vector<80x128xf32>, vector<32x128xf32> -> vector<32x128xf32>
    %c0_4 = arith.constant 0 : index
    %c0_5 = arith.constant 0 : index
    %4 = vector.load %arg7[%c0_4, %c0_5] : memref<8x128xf32, #tpu.memory_space<vmem>>, vector<1x128xf32>
    %5 = vector.broadcast %4 : vector<1x128xf32> to vector<32x128xf32>
    %6 = arith.addf %3, %5 : vector<32x128xf32>
    %cst_6 = arith.constant 0.000000e+00 : f32
    %7 = vector.broadcast %cst_6 : f32 to vector<32x128xf32>
    %8 = arith.maximumf %6, %7 : vector<32x128xf32>
    %c80 = arith.constant 80 : index
    %c0_7 = arith.constant 0 : index
    %9 = vector.load %arg5[%c80, %c0_7] : memref<320x128xf32, #tpu.memory_space<vmem>>, vector<128x128xf32>
    %cst_8 = arith.constant dense<0.000000e+00> : vector<32x128xf32>
    %10 = tpu.matmul %8, %9, %cst_8 {dimension_numbers = #tpu.dot_dimension_numbers<[1], [0], [0], [1], [0, 0, 1, 1], [], []>} : vector<32x128xf32>, vector<128x128xf32>, vector<32x128xf32> -> vector<32x128xf32>
    %c1 = arith.constant 1 : index
    %c0_9 = arith.constant 0 : index
    %11 = vector.load %arg7[%c1, %c0_9] : memref<8x128xf32, #tpu.memory_space<vmem>>, vector<1x128xf32>
    %12 = vector.broadcast %11 : vector<1x128xf32> to vector<32x128xf32>
    %13 = arith.addf %10, %12 : vector<32x128xf32>
    %cst_10 = arith.constant 0.000000e+00 : f32
    %14 = vector.broadcast %cst_10 : f32 to vector<32x128xf32>
    %15 = arith.maximumf %13, %14 : vector<32x128xf32>
    %cst_11 = arith.constant 0.000000e+00 : f32
    %16 = vector.broadcast %cst_11 : f32 to vector<4x128xf32>
    %17 = vector.extract_strided_slice %15 {offsets = [0, 0], sizes = [28, 128], strides = [1, 1]} : vector<32x128xf32> to vector<28x128xf32>
    %18 = tpu.concatenate %16, %17 in 0 : vector<4x128xf32>, vector<28x128xf32> -> vector<32x128xf32>
    %19 = tpu.concatenate %15, %18 in 1 : vector<32x128xf32>, vector<32x128xf32> -> vector<32x256xf32>
    %c0_12 = arith.constant 0 : index
    %c0_13 = arith.constant 0 : index
    %20 = vector.load %arg6[%c0_12, %c0_13] : memref<416x32xf32, #tpu.memory_space<vmem>>, vector<256x32xf32>
    %cst_14 = arith.constant dense<0.000000e+00> : vector<32x32xf32>
    %21 = tpu.matmul %19, %20, %cst_14 {dimension_numbers = #tpu.dot_dimension_numbers<[1], [0], [0], [1], [0, 0, 1, 1], [], []>} : vector<32x256xf32>, vector<256x32xf32>, vector<32x32xf32> -> vector<32x32xf32>
    %c2 = arith.constant 2 : index
    %c0_15 = arith.constant 0 : index
    %22 = vector.load %arg7[%c2, %c0_15] : memref<8x128xf32, #tpu.memory_space<vmem>>, vector<1x32xf32>
    %23 = vector.broadcast %22 : vector<1x32xf32> to vector<32x32xf32>
    %24 = arith.addf %21, %23 : vector<32x32xf32>
    %25 = vector.extract_strided_slice %24 {offsets = [0, 0], sizes = [4, 32], strides = [1, 1]} : vector<32x32xf32> to vector<4x32xf32>
    %26 = vector.extract_strided_slice %24 {offsets = [4, 0], sizes = [4, 32], strides = [1, 1]} : vector<32x32xf32> to vector<4x32xf32>
    %27 = arith.maximumf %25, %26 : vector<4x32xf32>
    %28 = vector.extract_strided_slice %24 {offsets = [8, 0], sizes = [4, 32], strides = [1, 1]} : vector<32x32xf32> to vector<4x32xf32>
    %29 = vector.extract_strided_slice %24 {offsets = [12, 0], sizes = [4, 32], strides = [1, 1]} : vector<32x32xf32> to vector<4x32xf32>
    %30 = arith.maximumf %28, %29 : vector<4x32xf32>
    %31 = vector.extract_strided_slice %24 {offsets = [16, 0], sizes = [4, 32], strides = [1, 1]} : vector<32x32xf32> to vector<4x32xf32>
    %32 = vector.extract_strided_slice %24 {offsets = [20, 0], sizes = [4, 32], strides = [1, 1]} : vector<32x32xf32> to vector<4x32xf32>
    %33 = arith.maximumf %31, %32 : vector<4x32xf32>
    %34 = vector.extract_strided_slice %24 {offsets = [24, 0], sizes = [4, 32], strides = [1, 1]} : vector<32x32xf32> to vector<4x32xf32>
    %35 = vector.extract_strided_slice %24 {offsets = [28, 0], sizes = [4, 32], strides = [1, 1]} : vector<32x32xf32> to vector<4x32xf32>
    %36 = arith.maximumf %34, %35 : vector<4x32xf32>
    %37 = tpu.concatenate %27, %30, %33, %36 in 1 : vector<4x32xf32>, vector<4x32xf32>, vector<4x32xf32>, vector<4x32xf32> -> vector<4x128xf32>
    %c256 = arith.constant 256 : index
    %c0_16 = arith.constant 0 : index
    %38 = vector.load %arg6[%c256, %c0_16] : memref<416x32xf32, #tpu.memory_space<vmem>>, vector<128x32xf32>
    %cst_17 = arith.constant dense<0.000000e+00> : vector<4x32xf32>
    %39 = tpu.matmul %37, %38, %cst_17 {dimension_numbers = #tpu.dot_dimension_numbers<[1], [0], [0], [1], [0, 0, 1, 1], [], []>} : vector<4x128xf32>, vector<128x32xf32>, vector<4x32xf32> -> vector<4x32xf32>
    %c3 = arith.constant 3 : index
    %c0_18 = arith.constant 0 : index
    %40 = vector.load %arg7[%c3, %c0_18] : memref<8x128xf32, #tpu.memory_space<vmem>>, vector<1x32xf32>
    %41 = vector.broadcast %40 : vector<1x32xf32> to vector<4x32xf32>
    %42 = arith.addf %39, %41 : vector<4x32xf32>
    %cst_19 = arith.constant 0.000000e+00 : f32
    %43 = vector.broadcast %cst_19 : f32 to vector<4x32xf32>
    %44 = arith.maximumf %42, %43 : vector<4x32xf32>
    %c384 = arith.constant 384 : index
    %c0_20 = arith.constant 0 : index
    %45 = vector.load %arg6[%c384, %c0_20] : memref<416x32xf32, #tpu.memory_space<vmem>>, vector<32x32xf32>
    %cst_21 = arith.constant dense<0.000000e+00> : vector<4x32xf32>
    %46 = tpu.matmul %44, %45, %cst_21 {dimension_numbers = #tpu.dot_dimension_numbers<[1], [0], [0], [1], [0, 0, 1, 1], [], []>} : vector<4x32xf32>, vector<32x32xf32>, vector<4x32xf32> -> vector<4x32xf32>
    %c4 = arith.constant 4 : index
    %c0_22 = arith.constant 0 : index
    %47 = vector.load %arg7[%c4, %c0_22] : memref<8x128xf32, #tpu.memory_space<vmem>>, vector<1x32xf32>
    %48 = vector.broadcast %47 : vector<1x32xf32> to vector<4x32xf32>
    %49 = arith.addf %46, %48 : vector<4x32xf32>
    %cst_23 = arith.constant 0.000000e+00 : f32
    %50 = vector.broadcast %cst_23 : f32 to vector<4x32xf32>
    %51 = arith.maximumf %49, %50 : vector<4x32xf32>
    %c0_24 = arith.constant 0 : index
    %c0_25 = arith.constant 0 : index
    %c0_26 = arith.constant 0 : index
    %52 = vector.load %arg2[%c0_24, %c0_25, %c0_26] : memref<1x4x16xf32, #tpu.memory_space<vmem>>, vector<1x4x16xf32>
    %53 = vector.shape_cast %52 : vector<1x4x16xf32> to vector<4x16xf32>
    %54 = tpu.concatenate %53, %51 in 1 : vector<4x16xf32>, vector<4x32xf32> -> vector<4x48xf32>
    %c208 = arith.constant 208 : index
    %c0_27 = arith.constant 0 : index
    %55 = vector.load %arg5[%c208, %c0_27] : memref<320x128xf32, #tpu.memory_space<vmem>>, vector<48x128xf32>
    %cst_28 = arith.constant dense<0.000000e+00> : vector<4x128xf32>
    %56 = tpu.matmul %54, %55, %cst_28 {dimension_numbers = #tpu.dot_dimension_numbers<[1], [0], [0], [1], [0, 0, 1, 1], [], []>} : vector<4x48xf32>, vector<48x128xf32>, vector<4x128xf32> -> vector<4x128xf32>
    %57 = vector.extract_strided_slice %56 {offsets = [0, 0], sizes = [4, 64], strides = [1, 1]} : vector<4x128xf32> to vector<4x64xf32>
    %58 = vector.extract_strided_slice %56 {offsets = [0, 64], sizes = [4, 64], strides = [1, 1]} : vector<4x128xf32> to vector<4x64xf32>
    %59 = tpu.concatenate %57, %58 in 0 : vector<4x64xf32>, vector<4x64xf32> -> vector<8x64xf32>
    %c0_29 = arith.constant 0 : index
    %c0_30 = arith.constant 0 : index
    %c0_31 = arith.constant 0 : index
    %60 = vector.load %arg3[%c0_29, %c0_30, %c0_31] : memref<1x16x8xf32, #tpu.memory_space<vmem>>, vector<1x16x8xf32>
    %61 = vector.shape_cast %60 : vector<1x16x8xf32> to vector<16x8xf32>
    %cst_32 = arith.constant dense<0.000000e+00> : vector<16x64xf32>
    %62 = tpu.matmul %61, %59, %cst_32 {dimension_numbers = #tpu.dot_dimension_numbers<[1], [0], [0], [1], [0, 0, 1, 1], [], []>} : vector<16x8xf32>, vector<8x64xf32>, vector<16x64xf32> -> vector<16x64xf32>
    %c5 = arith.constant 5 : index
    %c0_33 = arith.constant 0 : index
    %63 = vector.load %arg7[%c5, %c0_33] : memref<8x128xf32, #tpu.memory_space<vmem>>, vector<1x64xf32>
    %64 = vector.broadcast %63 : vector<1x64xf32> to vector<16x64xf32>
    %65 = arith.addf %62, %64 : vector<16x64xf32>
    %cst_34 = arith.constant 0.000000e+00 : f32
    %66 = vector.broadcast %cst_34 : f32 to vector<16x64xf32>
    %67 = arith.maximumf %65, %66 : vector<16x64xf32>
    %c256_35 = arith.constant 256 : index
    %c0_36 = arith.constant 0 : index
    %68 = vector.load %arg5[%c256_35, %c0_36] : memref<320x128xf32, #tpu.memory_space<vmem>>, vector<64x128xf32>
    %cst_37 = arith.constant dense<0.000000e+00> : vector<16x128xf32>
    %69 = tpu.matmul %67, %68, %cst_37 {dimension_numbers = #tpu.dot_dimension_numbers<[1], [0], [0], [1], [0, 0, 1, 1], [], []>} : vector<16x64xf32>, vector<64x128xf32>, vector<16x128xf32> -> vector<16x128xf32>
    %c6 = arith.constant 6 : index
    %c0_38 = arith.constant 0 : index
    %70 = vector.load %arg7[%c6, %c0_38] : memref<8x128xf32, #tpu.memory_space<vmem>>, vector<1x128xf32>
    %71 = vector.broadcast %70 : vector<1x128xf32> to vector<16x128xf32>
    %72 = arith.addf %69, %71 : vector<16x128xf32>
    %c0_39 = arith.constant 0 : index
    %c0_40 = arith.constant 0 : index
    %c0_41 = arith.constant 0 : index
    %73 = vector.load %arg4[%c0_39, %c0_40, %c0_41] : memref<1x16x128xf32, #tpu.memory_space<vmem>>, vector<1x16x128xf32>
    %74 = vector.shape_cast %73 : vector<1x16x128xf32> to vector<16x128xf32>
    %75 = arith.addf %72, %74 : vector<16x128xf32>
    %c0_42 = arith.constant 0 : index
    %c0_43 = arith.constant 0 : index
    %c0_44 = arith.constant 0 : index
    %76 = vector.load %arg8[%c0_42, %c0_43, %c0_44] : memref<1x16x128xf32, #tpu.memory_space<vmem>>, vector<1x16x128xf32>
    %77 = vector.shape_cast %76 : vector<1x16x128xf32> to vector<16x128xf32>
    %78 = vector.shape_cast %75 : vector<16x128xf32> to vector<1x16x128xf32>
    tpu.vector_store %arg8[%c0_42, %c0_43, %c0_44], %78 {strides = array<i32>} : memref<1x16x128xf32, #tpu.memory_space<vmem>>, vector<1x16x128xf32>,
    return
  }
  func.func @transform_0(%arg0: i32) -> (i32, i32, i32) {
    %c0_i32 = arith.constant 0 : i32
    %c0_i32_0 = arith.constant 0 : i32
    %c0_i32_1 = arith.constant 0 : i32
    return %arg0, %c0_i32, %c0_i32_0 : i32, i32, i32
  }
  func.func @transform_1(%arg0: i32) -> (i32, i32, i32) {
    %c0_i32 = arith.constant 0 : i32
    %c0_i32_0 = arith.constant 0 : i32
    %c0_i32_1 = arith.constant 0 : i32
    return %arg0, %c0_i32, %c0_i32_0 : i32, i32, i32
  }
  func.func @transform_2(%arg0: i32) -> (i32, i32, i32) {
    %c0_i32 = arith.constant 0 : i32
    %c0_i32_0 = arith.constant 0 : i32
    %c0_i32_1 = arith.constant 0 : i32
    return %arg0, %c0_i32, %c0_i32_0 : i32, i32, i32
  }
  func.func @transform_3(%arg0: i32) -> (i32, i32, i32) {
    %c0_i32 = arith.constant 0 : i32
    %c0_i32_0 = arith.constant 0 : i32
    %c0_i32_1 = arith.constant 0 : i32
    return %arg0, %c0_i32, %c0_i32_0 : i32, i32, i32
  }
  func.func @transform_4(%arg0: i32) -> (i32, i32) {
    %c0_i32 = arith.constant 0 : i32
    %c0_i32_0 = arith.constant 0 : i32
    %c0_i32_1 = arith.constant 0 : i32
    return %c0_i32, %c0_i32_0 : i32, i32
  }
  func.func @transform_5(%arg0: i32) -> (i32, i32) {
    %c0_i32 = arith.constant 0 : i32
    %c0_i32_0 = arith.constant 0 : i32
    %c0_i32_1 = arith.constant 0 : i32
    return %c0_i32, %c0_i32_0 : i32, i32
  }
  func.func @transform_6(%arg0: i32) -> (i32, i32) {
    %c0_i32 = arith.constant 0 : i32
    %c0_i32_0 = arith.constant 0 : i32
    %c0_i32_1 = arith.constant 0 : i32
    return %c0_i32, %c0_i32_0 : i32, i32
  }
  func.func @transform_7(%arg0: i32) -> (i32, i32, i32) {
    %c0_i32 = arith.constant 0 : i32
    %c0_i32_0 = arith.constant 0 : i32
    %c0_i32_1 = arith.constant 0 : i32
    return %arg0, %c0_i32, %c0_i32_0 : i32, i32, i32
  }
}

</mosaic_0001>

<bundles_post_ra>
// kernel: forward_train.1
= control target key start
LH: loop header
LB: loop body
LE: loop exit
PB: predicated region body
PF: predicated region fallthrough
CT: control target
= control target key end

     0   :  { %s1666_s24 = smov 0   ;;  %s2053_s0 = inlined_call_operand.vmem [shape: f32[8,32,80], index: 0, kind: input, shape index: {}]   ;;  %s2054_s1 = inlined_call_operand.vmem [shape: f32[8,4,16], index: 1, kind: input, shape index: {}]   ;;  %s2055_s2 = inlined_call_operand.vmem [shape: f32[8,16,8], index: 2, kind: input, shape index: {}]   ;;  %s2056_s3 = inlined_call_operand.vmem [shape: f32[8,16,128], index: 3, kind: input, shape index: {}]   ;;  %s2057_s4 = inlined_call_operand.vmem [shape: f32[320,128], index: 4, kind: input, shape index: {}]   ;;  %s2058_s5 = inlined_call_operand.vmem [shape: f32[416,32], index: 5, kind: input, shape index: {}]   ;;  %s2059_s6 = inlined_call_operand.vmem [shape: f32[8,128], index: 6, kind: input, shape index: {}]   ;;  %s2060_s7 = inlined_call_operand.vmem [shape: f32[8,16,128], index: 7, kind: output, shape index: {}]  }
   0x1 LB: > { %s1290_s25 = sadd.s32 4294967295, %s1618_s24   ;;  %p1294_p0 = scmp.ge.s32.totalorder %s1618_s24, 1  ;;  %s1618_s24 = sphi %s1666_s24, %s17_s24  }
   0x2   : > { %p266_p1 = scmp.lt.s32.totalorder %s1618_s24, 9 }
   0x4   : > { %p267_p2 = pnand %p1294_p0, %p266_p1 }
   0x5   : > { %p312_p3 = scmp.lt.s32.totalorder (!%p267_p2), %s1290_s25, 7  ;;  %s1622_s14 = smov (!%p267_p2), 32  }
   0x6   : > { %270 = sbr.rel (%p267_p2) target bundleno = 1988 (0x7c4), region = 48  ;;  %s1624_s16 = smov (!%p267_p2), 96  }
   0x7   : > { %s1625_s22 = smov (!%p267_p2), 16  }
   0xb   : > { %v349_v0 = vld [vmem:[%s2057_s4 + $0x48] sm:$0xff]  ;;  %v348_v1 = vld [vmem:[%s2057_s4 + $0x40] sm:$0xff]  ;;  %v347_v2 = vld [vmem:[%s2057_s4 + $0x38] sm:$0xff]  ;;  %s2062_s25 = smov (!%p312_p3, %s1290_s25), 7  ;;  %vm355_vm0 = vcmask 654336   ;;  %vm571_vm1 = vcmask 1043456  }
   0xc   : > { %1449 = vmatprep.subr.mxu0 %v349_v0  ;;  %v472_v3 = vld [vmem:[%s2057_s4 + $0xc8] sm:$0xff]  ;;  %v471_v4 = vld [vmem:[%s2057_s4 + $0xc0] sm:$0xff]  ;;  %v346_v5 = vld [vmem:[%s2057_s4 + $0x30] sm:$0xff]  ;;  %s1325_s15 = sshll.u32 %s2062_s25, 5  ;;  %vm1621_vm3 = vmmov 0   ;;  %vm734_vm4 = vcmask 261120  }
   0xd   : > { %1450 = vmatpush3.msra.mxu0 %v349_v0  ;;  %1475 = vmatprep.subr.mxu1 %v472_v3  ;;  %s1698_s18 = scalar_lea.vmem %s2053_s0, %s1325_s15  ;;  %v345_v6 = vld [vmem:[%s2057_s4 + $0x28] sm:$0xff]  ;;  %v470_v8 = vld [vmem:[%s2057_s4 + $0xb8] sm:$0xff]  ;;  %v344_v9 = vld [vmem:[%s2057_s4 + $0x20] sm:$0xff]  ;;  %s1623_s15 = smov 64   ;;  %vm736_vm5 = vcmask 523264   ;;  %vm738_vm6 = vcmask 785408  }
   0xe   : > { %1451 = vmatprep.subr.mxu0 %v348_v1  ;;  %1476 = vmatpush3.msra.mxu1 %v472_v3  ;;  %v336_v7 = vld [vmem:[%s1698_s18] sm:$0xff]  ;;  %v469_v10 = vld [vmem:[%s2057_s4 + $0xb0] sm:$0xff]  ;;  %v343_v11 = vld [vmem:[%s2057_s4 + $0x18] sm:$0xff]  ;;  %s1297_s23 = sshll.u32 %s2062_s25, 2  ;;  %vm920_vm7 = vcmask 130048   ;;  %vm928_vm8 = vcmask 392192  }
   0xf   : > { %1452 = vmatpush3.msra.mxu0 %v348_v1  ;;  %1477 = vmatprep.subr.mxu1 %v471_v4  ;;  %v468_v12 = vld [vmem:[%s2057_s4 + $0xa8] sm:$0xff]  ;;  %v342_v13 = vld [vmem:[%s2057_s4 + $0x10] sm:$0xff]  ;;  %v467_v14 = vld [vmem:[%s2057_s4 + $0xa0] sm:$0xff]  ;;  %s320_s28 = scalar_lea.vmem %s2054_s1, %s1297_s23  ;;  %s2002_s29 = sshll.u32 %s2062_s25, 4  ;;  %vm1015_vm9 = vcmask 64512  }
  0x10   : > { %1453 = vmatprep.subr.mxu0 %v347_v2  ;;  %1469 = vmatprep.mubr.msk.f32.mxu0 %vm355_vm0, %v336_v7  ;;  %v341_v15 = vld [vmem:[%s2057_s4 + $0x8] sm:$0xff]  ;;  %v466_v16 = vld [vmem:[%s2057_s4 + $0x98] sm:$0xff]  ;;  %v340_v17 = vld [vmem:[%s2057_s4] sm:$0xff]  ;;  %s325_s9 = scalar_lea.vmem %s2055_s2, %s2002_s29  ;;  %s335_s12 = scalar_lea.vmem %s2060_s7, %s2002_s29 }
  0x11   : > { %1454 = vmatpush3.msra.mxu0 %v347_v2  ;;  %1478 = vmatpush3.msra.mxu1 %v471_v4  ;;  %v465_v18 = vld [vmem:[%s2057_s4 + $0x90] sm:$0xff]  ;;  %v337_v19 = vld [vmem:[%s1698_s18 + $0x8] sm:$0xff]  ;;  %v463_v22 = vld [vmem:[%s2057_s4 + $0x80] sm:$0xff] }
  0x12   : > { %1455 = vmatprep.subr.mxu0 %v346_v5  ;;  %1479 = vmatprep.subr.mxu1 %v470_v8  ;;  %v464_v20 = vld [vmem:[%s2057_s4 + $0x88] sm:$0xff]  ;;  %v338_v21 = vld [vmem:[%s1698_s18 + $0x10] sm:$0xff]  ;;  %v339_v23 = vld [vmem:[%s1698_s18 + $0x18] sm:$0xff] }
  0x13   : > { %1456 = vmatpush3.msra.mxu0 %v346_v5  ;;  %1480 = vmatpush3.msra.mxu1 %v470_v8  ;;  %v462_v24 = vld [vmem:[%s2057_s4 + $0x78] sm:$0xff]  ;;  %v461_v25 = vld [vmem:[%s2057_s4 + $0x70] sm:$0xff]  ;;  %v460_v26 = vld [vmem:[%s2057_s4 + $0x68] sm:$0xff] }
  0x14   : > { %1457 = vmatprep.subr.mxu0 %v345_v6  ;;  %1481 = vmatprep.subr.mxu1 %v469_v10  ;;  %v459_v27 = vld [vmem:[%s2057_s4 + $0x60] sm:$0xff]  ;;  %v458_v28 = vld [vmem:[%s2057_s4 + $0x58] sm:$0xff]  ;;  %v457_v29 = vld [vmem:[%s2057_s4 + $0x50] sm:$0xff] }
  0x15   : > { %1458 = vmatpush3.msra.mxu0 %v345_v6  ;;  %1482 = vmatpush3.msra.mxu1 %v469_v10  ;;  %v615_v30 = vld [vmem:[%s2058_s5 + $0xf8] sm:$0xff]  ;;  %v614_v32 = vld [vmem:[%s2058_s5 + $0xf0] sm:$0xff]  ;;  %v613_v34 = vld [vmem:[%s2058_s5 + $0xe8] sm:$0xff] }
  0x16   : > { %1459 = vmatprep.subr.mxu0 %v344_v9  ;;  %1483 = vmatprep.subr.mxu1 %v468_v12  ;;  %v599_v31 = vld [vmem:[%s2058_s5 + $0x78] sm:$0xff]  ;;  %v598_v33 = vld [vmem:[%s2058_s5 + $0x70] sm:$0xff]  ;;  %v597_v35 = vld [vmem:[%s2058_s5 + $0x68] sm:$0xff] }
  0x17   : > { %1460 = vmatpush3.msra.mxu0 %v344_v9  ;;  %1484 = vmatpush3.msra.mxu1 %v468_v12  ;;  %v612_v36 = vld [vmem:[%s2058_s5 + $0xe0] sm:$0xff]  ;;  %v611_v38 = vld [vmem:[%s2058_s5 + $0xd8] sm:$0xff]  ;;  %v610_v40 = vld [vmem:[%s2058_s5 + $0xd0] sm:$0xff] }
  0x18   : > { %1461 = vmatprep.subr.mxu0 %v343_v11  ;;  %1485 = vmatprep.subr.mxu1 %v467_v14  ;;  %v596_v37 = vld [vmem:[%s2058_s5 + $0x60] sm:$0xff]  ;;  %v595_v39 = vld [vmem:[%s2058_s5 + $0x58] sm:$0xff]  ;;  %v594_v41 = vld [vmem:[%s2058_s5 + $0x50] sm:$0xff] }
  0x19   : > { %1462 = vmatpush3.msra.mxu0 %v343_v11  ;;  %1486 = vmatpush3.msra.mxu1 %v467_v14  ;;  %v609_v42 = vld [vmem:[%s2058_s5 + $0xc8] sm:$0xff]  ;;  %v608_v44 = vld [vmem:[%s2058_s5 + $0xc0] sm:$0xff]  ;;  %v607_v46 = vld [vmem:[%s2058_s5 + $0xb8] sm:$0xff] }
  0x1a   : > { %1463 = vmatprep.subr.mxu0 %v342_v13  ;;  %1487 = vmatprep.subr.mxu1 %v466_v16  ;;  %v593_v43 = vld [vmem:[%s2058_s5 + $0x48] sm:$0xff]  ;;  %v592_v45 = vld [vmem:[%s2058_s5 + $0x40] sm:$0xff]  ;;  %v591_v47 = vld [vmem:[%s2058_s5 + $0x38] sm:$0xff] }
  0x1b   : > { %1464 = vmatpush3.msra.mxu0 %v342_v13  ;;  %1488 = vmatpush3.msra.mxu1 %v466_v16  ;;  %v606_v48 = vld [vmem:[%s2058_s5 + $0xb0] sm:$0xff]  ;;  %v605_v50 = vld [vmem:[%s2058_s5 + $0xa8] sm:$0xff]  ;;  %v1304_v52 = vld [vmem:[%s2059_s6] ss:$0 sm:$0xff] }
  0x1c   : > { %1465 = vmatprep.subr.mxu0 %v341_v15  ;;  %1489 = vmatprep.subr.mxu1 %v465_v18  ;;  %v590_v49 = vld [vmem:[%s2058_s5 + $0x30] sm:$0xff]  ;;  %v589_v51 = vld [vmem:[%s2058_s5 + $0x28] sm:$0xff]  ;;  %v604_v1 = vld [vmem:[%s2058_s5 + $0xa0] sm:$0xff] }
  0x1d   : > { %1466 = vmatpush3.msra.mxu0 %v341_v15  ;;  %1490 = vmatpush3.msra.mxu1 %v465_v18  ;;  %v588_v2 = vld [vmem:[%s2058_s5 + $0x20] sm:$0xff]  ;;  %v603_v3 = vld [vmem:[%s2058_s5 + $0x98] sm:$0xff]  ;;  %v602_v5 = vld [vmem:[%s2058_s5 + $0x90] sm:$0xff] }
  0x1e   : > { %1467 = vmatprep.subr.mxu0 %v340_v17  ;;  %1491 = vmatprep.subr.mxu1 %v464_v20  ;;  %v587_v4 = vld [vmem:[%s2058_s5 + $0x18] sm:$0xff]  ;;  %v586_v6 = vld [vmem:[%s2058_s5 + $0x10] sm:$0xff]  ;;  %v601_v7 = vld [vmem:[%s2058_s5 + $0x88] sm:$0xff] }
  0x1f   : > { %1468 = vmatpush3.msra.mxu0 %v340_v17  ;;  %1492 = vmatpush3.msra.mxu1 %v464_v20  ;;  %v585_v8 = vld [vmem:[%s2058_s5 + $0x8] sm:$0xff]  ;;  %v600_v9 = vld [vmem:[%s2058_s5 + $0x80] sm:$0xff]  ;;  %vm1311_vm2 = vmneg %vm571_vm1 }
  0x20   : > { %1470 = vmatmul.mubr.msk.f32.vlgmr.msra.gmra.mxu0 %vm355_vm0, %v337_v19  ;;  %1493 = vmatprep.subr.mxu1 %v463_v22  ;;  %v584_v10 = vld [vmem:[%s2058_s5] sm:$0xff] }
  0x21   : > { %1472 = vmatprep.mubr.msk.f32.mxu0 %vm355_vm0, %v338_v21  ;;  %1494 = vmatpush3.msra.mxu1 %v463_v22  ;;  %v1309_v11 = vld [vmem:[%s2059_s6 + $0x1] ss:$0 sm:$0xff] }
  0x22   : > { %1495 = vmatprep.subr.mxu1 %v462_v24  ;;  %1363 = vmatprep.subr.mxu0 %v615_v30 }
  0x23   : > { %1496 = vmatpush3.msra.mxu1 %v462_v24  ;;  %1364 = vmatpush3.msra.mxu0 %v599_v31  ;;  %v755_v31 = vld [vmem:[%s2058_s5 + $0x178] sm:$0xff] }
  0x24   : > { %1473 = vmatmul.mubr.msk.f32.gmra.mxu0 %vm355_vm0, %v339_v23  ;;  %1497 = vmatprep.subr.mxu1 %v461_v25 }
  0x25   : > { %1498 = vmatpush3.msra.mxu1 %v461_v25  ;;  %1365 = vmatprep.subr.mxu0 %v614_v32  ;;  %v1620_v32 = vmov 0.0  }
  0x26   : > { %1499 = vmatprep.subr.mxu1 %v460_v26  ;;  %1366 = vmatpush3.msra.mxu0 %v598_v33  ;;  %v754_v33 = vld [vmem:[%s2058_s5 + $0x170] sm:$0xff] }
  0x27   : > { %1500 = vmatpush3.msra.mxu1 %v460_v26  ;;  %1367 = vmatprep.subr.mxu0 %v613_v34  ;;  %v753_v34 = vld [vmem:[%s2058_s5 + $0x168] sm:$0xff] }
  0x28   : > { %1501 = vmatprep.subr.mxu1 %v459_v27  ;;  %1368 = vmatpush3.msra.mxu0 %v597_v35  ;;  %v752_v35 = vld [vmem:[%s2058_s5 + $0x160] sm:$0xff] }
  0x29   : > { %1502 = vmatpush3.msra.mxu1 %v459_v27  ;;  %1369 = vmatprep.subr.mxu0 %v612_v36  ;;  %v751_v36 = vld [vmem:[%s2058_s5 + $0x158] sm:$0xff] }
  0x2a   : > { %1503 = vmatprep.subr.mxu1 %v458_v28  ;;  %1370 = vmatpush3.msra.mxu0 %v596_v37  ;;  %v750_v37 = vld [vmem:[%s2058_s5 + $0x150] sm:$0xff] }
  0x2b   : > { %1504 = vmatpush3.msra.mxu1 %v458_v28  ;;  %1371 = vmatprep.subr.mxu0 %v611_v38  ;;  %v749_v38 = vld [vmem:[%s2058_s5 + $0x148] sm:$0xff] }
  0x2c   : > { %1505 = vmatprep.subr.mxu1 %v457_v29  ;;  %1372 = vmatpush3.msra.mxu0 %v595_v39  ;;  %v748_v39 = vld [vmem:[%s2058_s5 + $0x140] sm:$0xff] }
  0x2d   : > { %1506 = vmatpush3.msra.mxu1 %v457_v29  ;;  %1373 = vmatprep.subr.mxu0 %v610_v40  ;;  %v747_v40 = vld [vmem:[%s2058_s5 + $0x138] sm:$0xff] }
  0x2e   : > { %1374 = vmatpush3.msra.mxu0 %v594_v41  ;;  %1513 = vmatprep.subr.mxu1 %v1620_v32  ;;  %v746_v41 = vld [vmem:[%s2058_s5 + $0x130] sm:$0xff] }
  0x2f   : > { %1375 = vmatprep.subr.mxu0 %v609_v42  ;;  %v745_v42 = vld [vmem:[%s2058_s5 + $0x128] sm:$0xff] }
  0x30   : > { %1376 = vmatpush3.msra.mxu0 %v593_v43 }
  0x31   : > { %1377 = vmatprep.subr.mxu0 %v608_v44  ;;  %v744_v44 = vld [vmem:[%s2058_s5 + $0x120] sm:$0xff] }
  0x32   : > { %1378 = vmatpush3.msra.mxu0 %v592_v45  ;;  %v1310_v45 = vld [vmem:[%s2059_s6 + $0x2] ss:$0 sm:$0xff] }
  0x33   : > { %1379 = vmatprep.subr.mxu0 %v607_v46 }
  0x34   : > { %1380 = vmatpush3.msra.mxu0 %v591_v47  ;;  %v743_v47 = vld [vmem:[%s2058_s5 + $0x118] sm:$0xff] }
  0x35   : > { %1381 = vmatprep.subr.mxu0 %v606_v48 }
  0x36   : > { %1382 = vmatpush3.msra.mxu0 %v590_v49 }
  0x37   : > { %1383 = vmatprep.subr.mxu0 %v605_v50 }
  0x38   : > { %1384 = vmatpush3.msra.mxu0 %v589_v51  ;;  %v742_v51 = vld [vmem:[%s2058_s5 + $0x110] sm:$0xff] }
  0x39   : > { %1385 = vmatprep.subr.mxu0 %v604_v1 }
  0x3a   : > { %1386 = vmatpush3.msra.mxu0 %v588_v2 }
  0x3b   : > { %1387 = vmatprep.subr.mxu0 %v603_v3 }
  0x3c   : > { %1388 = vmatpush3.msra.mxu0 %v587_v4 }
  0x3d   : > { %1389 = vmatprep.subr.mxu0 %v602_v5 }
  0x3e   : > { %1390 = vmatpush3.msra.mxu0 %v586_v6 }
  0x3f   : > { %1391 = vmatprep.subr.mxu0 %v601_v7 }
  0x40   : > { %1392 = vmatpush3.msra.mxu0 %v585_v8 }
  0x41   : > { %1393 = vmatprep.subr.mxu0 %v600_v9 }
  0x42   : > { %1394 = vmatpush3.msra.mxu0 %v584_v10 }
  0xe0   : > { %v1471_v53 = vpop.f32.mrf.mxu0 }
  0xe1   : > { %v440_v54 = vadd.f32 %v1471_v53, %v1304_v52  ;;  %v741_v53 = vld [vmem:[%s2058_s5 + $0x108] sm:$0xff] }
  0xe2   : > { %v434_v55 = vpop.f32.mrf.mxu0 }
  0xe3   : > { %v435_v56 = vadd.f32 %v1304_v52, %v434_v55  ;;  %v454_v60 = vmax.f32 %v440_v54, 0.0 }
  0xe4   : > { %v1474_v57 = vpop.f32.mrf.mxu0 }
  0xe5   : > { %v450_v58 = vadd.f32 %v1474_v57, %v1304_v52  ;;  %v453_v59 = vmax.f32 %v435_v56, 0.0  ;;  %v740_v57 = vld [vmem:[%s2058_s5 + $0x100] sm:$0xff] }
  0xe6   : > { %v444_v61 = vpop.f32.mrf.mxu0 }
  0xe7   : > { %v445_v62 = vadd.f32 %v1304_v52, %v444_v61  ;;  %1507 = vmatprep.mubr.f32.mxu1 %v453_v59  ;;  %v456_v63 = vmax.f32 %v450_v58, 0.0 }
  0xe8   : > { %1508 = vmatmul.mubr.f32.vlgmr.msra.gmra.mxu1 %v454_v60 }
  0xe9   : > { %v455_v0 = vmax.f32 %v445_v62, 0.0  ;;  %1514 = vmatpush3.msra.mxu1 %v755_v31 }
  0xea   : > { %1515 = vmatprep.subr.mxu1 %v1620_v32 }
  0xeb   : > { %1510 = vmatprep.mubr.f32.mxu1 %v455_v0  ;;  %1516 = vmatpush3.msra.mxu1 %v754_v33 }
  0xec   : > { %1511 = vmatmul.mubr.f32.gmra.mxu1 %v456_v63  ;;  %1517 = vmatprep.subr.mxu1 %v1620_v32 }
  0xed   : > { %1518 = vmatpush3.msra.mxu1 %v753_v34  ;;  %1545 = vmatprep.mubr.msk.f32.mxu1 %vm1621_vm3, %v1620_v32 }
  0xee   : > { %1519 = vmatprep.subr.mxu1 %v1620_v32 }
  0xef   : > { %1520 = vmatpush3.msra.mxu1 %v752_v35 }
  0xf0   : > { %1521 = vmatprep.subr.mxu1 %v1620_v32 }
  0xf1   : > { %1522 = vmatpush3.msra.mxu1 %v751_v36 }
  0xf2   : > { %1523 = vmatprep.subr.mxu1 %v1620_v32 }
  0xf3   : > { %1524 = vmatpush3.msra.mxu1 %v750_v37 }
  0xf4   : > { %1525 = vmatprep.subr.mxu1 %v1620_v32 }
  0xf5   : > { %1526 = vmatpush3.msra.mxu1 %v749_v38  ;;  %v1008_v38 = vld [vmem:[%s325_s9] sm:$0xff] }
  0xf6   : > { %1527 = vmatprep.subr.mxu1 %v1620_v32 }
  0xf7   : > { %1528 = vmatpush3.msra.mxu1 %v748_v39 }
  0xf8   : > { %1529 = vmatprep.subr.mxu1 %v1620_v32 }
  0xf9   : > { %1530 = vmatpush3.msra.mxu1 %v747_v40 }
  0xfa   : > { %1531 = vmatprep.subr.mxu1 %v1620_v32 }
  0xfb   : > { %1532 = vmatpush3.msra.mxu1 %v746_v41 }
  0xfc   : > { %1533 = vmatprep.subr.mxu1 %v1620_v32 }
  0xfd   : > { %1534 = vmatpush3.msra.mxu1 %v745_v42 }
  0xfe   : > { %1535 = vmatprep.subr.mxu1 %v1620_v32 }
  0xff   : > { %1536 = vmatpush3.msra.mxu1 %v744_v44  ;;  %v1009_v44 = vld [vmem:[%s325_s9 + $0x8] sm:$0xff]  ;;  %s330_s9 = scalar_lea.vmem %s2056_s3, %s2002_s29 }
 0x100   : > { %1537 = vmatprep.subr.mxu1 %v1620_v32 }
 0x101   : > { %1538 = vmatpush3.msra.mxu1 %v743_v47  ;;  %v1104_v47 = vld [vmem:[%s2057_s4 + $0x128] sm:$0xff] }
 0x102   : > { %1539 = vmatprep.subr.mxu1 %v1620_v32 }
 0x103   : > { %1540 = vmatpush3.msra.mxu1 %v742_v51  ;;  %v1100_v51 = vld [vmem:[%s2057_s4 + $0x108] sm:$0xff] }
 0x104   : > { %1541 = vmatprep.subr.mxu1 %v1620_v32 }
 0x105   : > { %1542 = vmatpush3.msra.mxu1 %v741_v53  ;;  %v1317_v53 = vld [vmem:[%s2059_s6 + $0x5] ss:$0 sm:$0xff] }
 0x106   : > { %1543 = vmatprep.subr.mxu1 %v1620_v32 }
 0x107   : > { %1544 = vmatpush3.msra.mxu1 %v740_v57 }
 0x108   : > { %1548 = vmatprep.subr.mxu1 %v1620_v32 }
 0x1a8   : > { %v1509_v12 = vpop.f32.mrf.mxu1 }
 0x1a9   : > { %v550_v13 = vadd.f32 %v1509_v12, %v1309_v11 }
 0x1aa   : > { %v544_v14 = vpop.f32.mrf.mxu1 }
 0x1ab   : > { %v564_v15 = vmax.f32 %v550_v13, 0.0  ;;  %v545_v16 = vadd.f32 %v1309_v11, %v544_v14  ;;  %v835_v14 = vld [vmem:[%s2058_s5 + $0x198] sm:$0xff] }
 0x1ac   : > { %v1512_v17 = vpop.f32.mrf.mxu1 }
 0x1ad   : > { %v563_v18 = vmax.f32 %v545_v16, 0.0  ;;  %v573_v20 = vrot.slane %v564_v15, 4  ;;  %v560_v23 = vadd.f32 %v1512_v17, %v1309_v11  ;;  %v834_v16 = vld [vmem:[%s2058_s5 + $0x190] sm:$0xff]  ;;  %v833_v17 = vld [vmem:[%s2058_s5 + $0x188] sm:$0xff] }
 0x1ae   : > { %v554_v19 = vpop.f32.mrf.mxu1 }
 0x1af   : > { %v572_v21 = vrot.slane %v563_v18, 4  ;;  %v555_v22 = vadd.f32 %v1309_v11, %v554_v19  ;;  %v566_v27 = vmax.f32 %v560_v23, 0.0  ;;  %v1313_v19 = vld [vmem:[%s2059_s6 + $0x3] ss:$0 sm:$0xff] }
 0x1b1   : > { %v565_v24 = vmax.f32 %v555_v22, 0.0  ;;  %1312 = vmatprep.mubr.msk.f32.mxu0 %vm1311_vm2, %v572_v21  ;;  %v574_v25 = vsel %vm571_vm1, %v572_v21, %v573_v20  ;;  %v577_v29 = vrot.slane %v566_v27, 4 }
 0x1b2   : > { %686 = vmatmul.mubr.f32.vlgmr.msra.gmra.mxu0 %v563_v18  ;;  %v832_v18 = vld [vmem:[%s2058_s5 + $0x180] sm:$0xff] }
 0x1b3   : > { %v575_v26 = vrot.slane %v565_v24, 4  ;;  %690 = vmatprep.mubr.f32.mxu0 %v574_v25  ;;  %v926_v25 = vld [vmem:[%s2057_s4 + $0xf0] sm:$0xff] }
 0x1b5   : > { %v576_v28 = vsel %vm571_vm1, %v573_v20, %v575_v26  ;;  %v578_v30 = vsel %vm571_vm1, %v575_v26, %v577_v29  ;;  %v925_v26 = vld [vmem:[%s2057_s4 + $0xe8] sm:$0xff]  ;;  %v922_v29 = vld [vmem:[%s2057_s4 + $0xd0] sm:$0xff] }
 0x1b6   : > { %691 = vmatmul.mubr.f32.gmra.mxu0 %v564_v15 }
 0x1b7   : > { %695 = vmatprep.mubr.f32.mxu0 %v576_v28  ;;  %v923_v28 = vld [vmem:[%s2057_s4 + $0xd8] sm:$0xff] }
 0x1ba   : > { %696 = vmatmul.mubr.f32.gmra.mxu0 %v565_v24  ;;  %v927_v24 = vld [vmem:[%s2057_s4 + $0xf8] sm:$0xff] }
 0x1bb   : > { %700 = vmatprep.mubr.f32.mxu0 %v578_v30  ;;  %v1314_v30 = vld [vmem:[%s2059_s6 + $0x4] ss:$0 sm:$0xff] }
 0x1be   : > { %701 = vmatmul.mubr.f32.gmra.mxu0 %v566_v27  ;;  %v924_v27 = vld [vmem:[%s2057_s4 + $0xe0] sm:$0xff] }
 0x1bf   : > { %1576 = vmatprep.mubr.msk.f32.mxu0 %vm1015_vm9, %v1008_v38 }
 0x272   : > { %v1395_v43 = vpop.f32.mrf.mxu0 }
 0x274   : > { %v1396_v46 = vpop.f32.mrf.mxu0 }
 0x275   : > { %v1397_v48 = vadd.f32 %v1396_v46, %v1395_v43  ;;  %v1105_v46 = vld [vmem:[%s2057_s4 + $0x130] sm:$0xff] }
 0x276   : > { %v1398_v49 = vpop.f32.mrf.mxu0 }
 0x277   : > { %v688_v50 = vadd.f32 %v1397_v48, %v1310_v45  ;;  %v1103_v48 = vld [vmem:[%s2057_s4 + $0x120] sm:$0xff] }
 0x278   : > { %v1399_v52 = vpop.f32.mrf.mxu0 }
 0x279   : > { %v1400_v54 = vadd.f32 %v1399_v52, %v1398_v49  ;;  %v707_v8 = vrot.slane %v688_v50, 4  ;;  %v1102_v49 = vld [vmem:[%s2057_s4 + $0x118] sm:$0xff]  ;;  %v1099_v52 = vld [vmem:[%s2057_s4 + $0x100] sm:$0xff] }
 0x27a   : > { %v1401_v55 = vpop.f32.mrf.mxu0 }
 0x27b   : > { %v693_v56 = vadd.f32 %v1400_v54, %v1310_v45  ;;  %v709_v9 = vmax.f32 %v688_v50, %v707_v8  ;;  %v1101_v50 = vld [vmem:[%s2057_s4 + $0x110] sm:$0xff] }
 0x27c   : > { %v1402_v58 = vpop.f32.mrf.mxu0 }
 0x27d   : > { %v1403_v59 = vadd.f32 %v1402_v58, %v1401_v55  ;;  %v711_v60 = vrot.slane %v693_v56, 4 }
 0x27e   : > { %v1404_v61 = vpop.f32.mrf.mxu0 }
 0x27f   : > { %v698_v62 = vadd.f32 %v1403_v59, %v1310_v45  ;;  %v713_v63 = vmax.f32 %v693_v56, %v711_v60  ;;  %v1320_v60 = vld [vmem:[%s2059_s6 + $0x6] ss:$0 sm:$0xff] }
 0x280   : > { %v1405_v0 = vpop.f32.mrf.mxu0 }
 0x281   : > { %v715_v1 = vrot.slane %v698_v62, 4  ;;  %v1406_v2 = vadd.f32 %v1405_v0, %v1404_v61  ;;  %723 = vrot.lane.b32.xlu0 %v713_v63, %s1622_s14 }
 0x283   : > { %v703_v3 = vadd.f32 %v1406_v2, %v1310_v45  ;;  %v717_v4 = vmax.f32 %v698_v62, %v715_v1  ;;  %v1106_v45 = vld [vmem:[%s2057_s4 + $0x138] sm:$0xff]  ;;  %v1194_v62 = vld [vmem:[%s330_s9 + $0x8] sm:$0xff]  ;;  %v1193_v1 = vld [vmem:[%s330_s9] sm:$0xff] }
 0x285   : > { %727 = vrot.lane.b32.xlu0 %v717_v4, %s1623_s15  ;;  %v719_v5 = vrot.slane %v703_v3, 4 }
 0x287   : > { %v721_v6 = vmax.f32 %v703_v3, %v719_v5 }
 0x289   : > { %731 = vrot.lane.b32.xlu1 %v721_v6, %s1624_s16 }
 0x2f3   : > { %v724_v7 = vpop.permute.xlu0 %723 }
 0x2f4   : > { %v735_v11 = vsel %vm734_vm4, %v709_v9, %v724_v7 }
 0x2f7   : > { %v728_v10 = vpop.permute.xlu0 %727 }
 0x2f8   : > { %v737_v12 = vsel %vm736_vm5, %v735_v11, %v728_v10 }
 0x2fb   : > { %v732_v13 = vpop.permute.xlu1 %731 }
 0x2fc   : > { %v739_v15 = vsel %vm738_vm6, %v737_v12, %v732_v13 }
 0x2fd   : > { %1546 = vmatmul.mubr.f32.vlgmr.msra.gmra.mxu1 %v739_v15 }
 0x2fe   : > { %1549 = vmatpush3.msra.mxu1 %v835_v14  ;;  %1556 = vmatprep.mubr.msk.f32.mxu1 %vm1621_vm3, %v1620_v32 }
 0x2ff   : > { %1550 = vmatprep.subr.mxu1 %v1620_v32 }
 0x300   : > { %1551 = vmatpush3.msra.mxu1 %v834_v16 }
 0x301   : > { %1552 = vmatprep.subr.mxu1 %v1620_v32 }
 0x302   : > { %1553 = vmatpush3.msra.mxu1 %v833_v17 }
 0x303   : > { %1554 = vmatprep.subr.mxu1 %v1620_v32 }
 0x304   : > { %1555 = vmatpush3.msra.mxu1 %v832_v18 }
 0x305   : > { %1559 = vmatprep.subr.mxu1 %v1620_v32 }
 0x3bd   : > { %v827_v20 = vpop.f32.mrf.mxu1 }
 0x3be   : > { %v828_v21 = vadd.f32 %v1313_v19, %v827_v20 }
 0x3bf   : > { %v1547_v22 = vpop.f32.mrf.mxu1 }
 0x3c0   : > { %v831_v23 = vmax.f32 %v828_v21, 0.0 }
 0x3c2   : > { %1557 = vmatmul.mubr.msk.f32.vlgmr.msra.gmra.mxu1 %vm734_vm4, %v831_v23 }
 0x3c3   : > { %1571 = vmatprep.mubr.msk.f32.mxu1 %vm1621_vm3, %v1620_v32  ;;  %1560 = vmatpush3.msra.mxu1 %v927_v24 }
 0x3c4   : > { %1561 = vmatprep.subr.mxu1 %v1620_v32 }
 0x3c5   : > { %1562 = vmatpush3.msra.mxu1 %v926_v25 }
 0x3c6   : > { %1563 = vmatprep.subr.mxu1 %v1620_v32 }
 0x3c7   : > { %1564 = vmatpush3.msra.mxu1 %v925_v26 }
 0x3c8   : > { %1565 = vmatprep.subr.mxu1 %v1620_v32 }
 0x3c9   : > { %1566 = vmatpush3.msra.mxu1 %v924_v27 }
 0x3ca   : > { %1567 = vmatprep.subr.mxu1 %v1620_v32 }
 0x3cb   : > { %1568 = vmatpush3.msra.mxu1 %v923_v28 }
 0x3cc   : > { %1569 = vmatprep.subr.mxu1 %v1620_v32  ;;  %v915_v32 = vld [vmem:[%s320_s28] sm:$0xf] }
 0x3cd   : > { %1570 = vmatpush3.msra.mxu1 %v922_v29 }
 0x482   : > { %v910_v31 = vpop.f32.mrf.mxu1 }
 0x483   : > { %v911_v33 = vadd.f32 %v1314_v30, %v910_v31 }
 0x484   : > { %v1558_v34 = vpop.f32.mrf.mxu1 }
 0x485   : > { %v914_v35 = vmax.f32 %v911_v33, 0.0 }
 0x487   : > { %917 = vrot.lane.b32.xlu1 %v914_v35, %s1625_s22 }
 0x4f9   : > { %v918_v36 = vpop.permute.xlu1 %917 }
 0x4fa   : > { %v921_v37 = vsel %vm920_vm7, %v915_v32, %v918_v36 }
 0x4fb   : > { %1572 = vmatmul.mubr.msk.f32.vlgmr.msra.gmra.mxu1 %vm928_vm8, %v921_v37 }
 0x5bb   : > { %v998_v39 = vpop.f32.mrf.mxu1 }
 0x5bc   : > { %v1003_v40 = vrot.slane %v998_v39, 4 }
 0x5bd   : > { %v1573_v41 = vpop.f32.mrf.mxu1 }
 0x5be   : > { %1004 = vrot.lane.b32.xlu0 %v1003_v40, %s1623_s15 }
 0x630   : > { %v1005_v42 = vpop.permute.xlu0 %1004 }
 0x631   : > { %v1007_v43 = vsel %vm571_vm1, %v998_v39, %v1005_v42 }
 0x632   : > { %1574 = vmatprep.subr.mxu0 %v1007_v43 }
 0x633   : > { %1575 = vmatpush3.msra.mxu0 %v1007_v43 }
 0x634   : > { %1577 = vmatmul.mubr.msk.f32.vlgmr.msra.gmra.mxu0 %vm1015_vm9, %v1009_v44  ;;  %1579 = vmatprep.subr.mxu0 %v1106_v45 }
 0x635   : > { %1580 = vmatpush3.msra.mxu0 %v1106_v45 }
 0x636   : > { %1581 = vmatprep.subr.mxu0 %v1105_v46 }
 0x637   : > { %1582 = vmatpush3.msra.mxu0 %v1105_v46 }
 0x638   : > { %1583 = vmatprep.subr.mxu0 %v1104_v47 }
 0x639   : > { %1584 = vmatpush3.msra.mxu0 %v1104_v47 }
 0x63a   : > { %1585 = vmatprep.subr.mxu0 %v1103_v48 }
 0x63b   : > { %1586 = vmatpush3.msra.mxu0 %v1103_v48 }
 0x63c   : > { %1587 = vmatprep.subr.mxu0 %v1102_v49 }
 0x63d   : > { %1588 = vmatpush3.msra.mxu0 %v1102_v49 }
 0x63e   : > { %1589 = vmatprep.subr.mxu0 %v1101_v50 }
 0x63f   : > { %1590 = vmatpush3.msra.mxu0 %v1101_v50 }
 0x640   : > { %1591 = vmatprep.subr.mxu0 %v1100_v51 }
 0x641   : > { %1592 = vmatpush3.msra.mxu0 %v1100_v51 }
 0x642   : > { %1593 = vmatprep.subr.mxu0 %v1099_v52 }
 0x643   : > { %1594 = vmatpush3.msra.mxu0 %v1099_v52 }
 0x6f4   : > { %v1578_v54 = vpop.f32.mrf.mxu0 }
 0x6f5   : > { %v1094_v55 = vadd.f32 %v1578_v54, %v1317_v53 }
 0x6f6   : > { %v1088_v56 = vpop.f32.mrf.mxu0 }
 0x6f7   : > { %v1089_v57 = vadd.f32 %v1317_v53, %v1088_v56  ;;  %v1098_v59 = vmax.f32 %v1094_v55, 0.0 }
 0x6f9   : > { %v1097_v58 = vmax.f32 %v1089_v57, 0.0 }
 0x6fb   : > { %1595 = vmatprep.mubr.msk.f32.mxu0 %vm736_vm5, %v1097_v58 }
 0x6fc   : > { %1596 = vmatmul.mubr.msk.f32.vlgmr.msra.gmra.mxu0 %vm736_vm5, %v1098_v59 }
 0x7bc   : > { %v1597_v61 = vpop.f32.mrf.mxu0 }
 0x7bd   : > { %v1190_v63 = vadd.f32 %v1597_v61, %v1320_v60 }
 0x7be   : > { %v1184_v0 = vpop.f32.mrf.mxu0 }
 0x7bf   : > { %v1196_v2 = vadd.f32 %v1194_v62, %v1190_v63  ;;  %v1185_v3 = vadd.f32 %v1320_v60, %v1184_v0 }
 0x7c1   : > { %1198 = vst [vmem:[%s335_s12 + $0x8] sm:$0xff] %v1196_v2  ;;  %v1195_v4 = vadd.f32 %v1193_v1, %v1185_v3 }
 0x7c3   : > { %1197 = vst [vmem:[%s335_s12] sm:$0xff] %v1195_v4 }
 0x7c4 PF: > { %s17_s24 = sadd.s32 1, %s1618_s24  }
 0x7c5   : > { %p14_p4 = scmp.ge.s32.totalorder %s17_s24, 10  }
 0x7c7   :  { %16 = sbr.rel (!%p14_p4) target bundleno = 1 (0x1), region = 87 }

</bundles_post_ra>
